<compile_context>
chip_gen: v7x
topology: tpu7x:2x2x1
jax: 0.10.0
libtpu: 0.0.40
codegen_flags: <defaults>
</compile_context>

<pallas_src>
import functools
import math

import jax
import jax.numpy as jnp
from jax.experimental import pallas as pl
from jax.experimental.pallas import tpu as pltpu

_SQRT_2_OVER_PI = math.sqrt(2.0 / math.pi)
_GELU_COEF = 0.044715
_LANE = 128


def _cdiv(a, b):
    return -(-a // b)


def _round_up(a, b):
    return _cdiv(a, b) * b


# ---------------------------------------------------------------------------
# Kernel body
# ---------------------------------------------------------------------------
def _gelu_kernel(x_ref, o_ref):
    xf = x_ref[...].astype(jnp.float32)
    # factored form: sqrt(2/pi) * (x + c*x^3) == sqrt(2/pi) * x * (1 + c*x*x)
    inner = _SQRT_2_OVER_PI * xf * (1.0 + _GELU_COEF * xf * xf)
    o_ref[...] = (0.5 * xf * (1.0 + jnp.tanh(inner))).astype(o_ref.dtype)


# ---------------------------------------------------------------------------
# Generation-aware sizing
# ---------------------------------------------------------------------------
@functools.lru_cache(maxsize=1)
def _hw_config():
    """Returns (target_tile_bytes, vmem_limit_bytes, two_tensorcores)."""
    kind = ""
    try:
        kind = jax.devices()[0].device_kind.lower()
    except Exception:
        pass
    vmem_cap = None
    try:
        vmem_cap = int(pltpu.get_tpu_info().vmem_capacity_bytes)
    except Exception:
        vmem_cap = None
    if vmem_cap is None:
        vmem_cap = (64 if "v7" in kind else 128) * 1024 * 1024
    two_cores = ("v7" in kind) or (vmem_cap <= 64 * 1024 * 1024)
    if vmem_cap <= 64 * 1024 * 1024:
        # v7x: 64 MiB VMEM per TensorCore.  6 MiB tiles -> ~24 MiB live with
        # default double buffering of in + out; 40 MiB limit leaves slack for
        # Mosaic internal scratch.
        return 6 * 1024 * 1024, 40 * 1024 * 1024, two_cores
    # v5e / v6e: 128 MiB VMEM.  8 MiB tiles -> ~32 MiB live, 64 MiB limit.
    return 8 * 1024 * 1024, 64 * 1024 * 1024, two_cores


def _pick_lane_width(n):
    """Largest lane width in {2048,...,128} (multiple of 128) dividing n."""
    for lw in (2048, 1024, 512, 256, 128):
        if n % lw == 0:
            return lw
    return None


def _tile_rows_for(rows, lanes, itemsize, target_tile_bytes, two_cores):
    """Byte-targeted row tile, rounded to the dtype's sublane multiple."""
    # f32 -> 8 rows per sublane group, bf16 -> 16, int8/fp8 -> 32
    sub = max(1, (8 * 4) // itemsize)
    if rows <= sub:
        return rows
    t = max(sub, target_tile_bytes // (lanes * itemsize))
    t = min(t, rows)
    t = max(sub, (t // sub) * sub)
    if two_cores:
        # v7x only: the "parallel" grid axis is sharded across 2 TensorCores.
        if t >= rows:
            # keep at least 2 tiles so both cores get work
            t = max(sub, _round_up(_cdiv(rows, 2), sub))
        g = _cdiv(rows, t)
        if 1 < g <= 8 and g % 2 == 1:
            # small odd grid -> one core gets an extra tile; rebalance to even
            t2 = max(sub, _round_up(_cdiv(rows, g + 1), sub))
            if _cdiv(rows, t2) % 2 == 0:
                t = t2
    return t


# ---------------------------------------------------------------------------
# pallas_call wrapper on a lane-dense 2-D slab
# ---------------------------------------------------------------------------
def _run_2d(x2, itemsize):
    rows, lanes = x2.shape
    target_tile_bytes, vmem_limit, two_cores = _hw_config()
    tile_rows = _tile_rows_for(rows, lanes, itemsize, target_tile_bytes, two_cores)
    grid = (_cdiv(rows, tile_rows),)
    n_elems = rows * lanes
    return pl.pallas_call(
        _gelu_kernel,
        out_shape=jax.ShapeDtypeStruct((rows, lanes), x2.dtype),
        grid_spec=pltpu.PrefetchScalarGridSpec(
            num_scalar_prefetch=0,
            grid=grid,
            in_specs=[pl.BlockSpec((tile_rows, lanes), lambda i: (i, 0))],
            out_specs=pl.BlockSpec((tile_rows, lanes), lambda i: (i, 0)),
        ),
        compiler_params=pltpu.CompilerParams(
            dimension_semantics=("parallel",),
            vmem_limit_bytes=vmem_limit,
        ),
        # Advisory: HBM-bound elementwise op -> helps XLA schedule neighbours.
        cost_estimate=pl.CostEstimate(
            flops=8 * n_elems,
            transcendentals=n_elems,
            bytes_accessed=2 * n_elems * itemsize,
        ),
        # NOTE: if the caller can donate x, input_output_aliases={0: 0} would
        # reuse the input HBM buffer; left off since donation isn't guaranteed.
    )(x2)


def _gelu_jnp(x):
    """Plain-XLA tail path (same math: f32 compute, cast back)."""
    xf = x.astype(jnp.float32)
    y = 0.5 * xf * (1.0 + jnp.tanh(_SQRT_2_OVER_PI * xf * (1.0 + _GELU_COEF * xf * xf)))
    return y.astype(x.dtype)


def gelu(x):
    """tanh-approx GELU (matches the PyTorch module), any shape / dtype."""
    orig_shape = x.shape
    n = x.size
    if n == 0:
        return x
    itemsize = jnp.dtype(x.dtype).itemsize
    flat = x.reshape(-1)

    lanes = _pick_lane_width(n)
    if lanes is not None:
        # Fast path: exact lane-dense reshape (no padding, no slicing).
        rows = n // lanes
        out = _run_2d(flat.reshape(rows, lanes), itemsize)
        return out.reshape(orig_shape)

    # Element count not a multiple of 128: run the kernel on the first
    # n - (n % 128) elements, finish the < 128-element tail with plain XLA.
    rem = n % _LANE
    n_main = n - rem
    if n_main == 0:
        # tiny tensor (< 128 elements): a kernel launch is not worth it
        return _gelu_jnp(flat).reshape(orig_shape)
    main_lanes = _pick_lane_width(n_main)
    main = _run_2d(flat[:n_main].reshape(n_main // main_lanes, main_lanes), itemsize)
    tail = _gelu_jnp(flat[n_main:])
    return jnp.concatenate([main.reshape(-1), tail]).reshape(orig_shape)


def gelu_ref(x):
    xf = x.astype(jnp.float32)
    y = 0.5 * xf * (1.0 + jnp.tanh(_SQRT_2_OVER_PI * (xf + _GELU_COEF * xf ** 3)))
    return y.astype(x.dtype)


if __name__ == "__main__":
    key = jax.random.PRNGKey(0)
    # small activation shape consistent with an LLM feed-forward: (batch, seq, hidden)
    x = jax.random.normal(key, (2, 8, 32), dtype=jnp.float32)
    y = gelu(x)
    jax.block_until_ready(y)
    assert y.shape == x.shape and y.dtype == x.dtype
    assert jnp.allclose(y, gelu_ref(x), atol=1e-5, rtol=1e-5)

    # bf16 path (sublane multiple = 16)
    xb = jax.random.normal(jax.random.PRNGKey(1), (2, 16, 128), dtype=jnp.bfloat16)
    yb = gelu(xb)
    jax.block_until_ready(yb)
    assert jnp.allclose(yb.astype(jnp.float32), gelu_ref(xb).astype(jnp.float32),
                        atol=2e-2, rtol=2e-2)

    # element count not a multiple of 128 (kernel main + XLA tail, no jnp.pad)
    xo = jax.random.normal(jax.random.PRNGKey(2), (2, 8, 130), dtype=jnp.float32)
    yo = gelu(xo)
    jax.block_until_ready(yo)
    assert jnp.allclose(yo, gelu_ref(xo), atol=1e-5, rtol=1e-5)

    print("KERNEL_OK")
</pallas_src>

<mosaic_0001>
module attributes {stable_mosaic.version = 11 : i64} {
  func.func @_gelu_kernel(%arg0: i32, %arg1: memref<1x512xf32, #tpu.memory_space<vmem>>, %arg2: memref<1x512xf32, #tpu.memory_space<vmem>>) attributes {dimension_semantics = [#tpu.dimension_semantics<parallel>], iteration_bounds = array<i64: 1>, scalar_prefetch = 0 : i64, scratch_operands = 0 : i64, tpu.core_type = #tpu.core_type<tc>, window_params = [{transform_indices = @transform_0, window_bounds = array<i64: 1, 512>}, {transform_indices = @transform_1, window_bounds = array<i64: 1, 512>}]} {
    %c0 = arith.constant 0 : index
    %c0_0 = arith.constant 0 : index
    %0 = vector.load %arg1[%c0, %c0_0] : memref<1x512xf32, #tpu.memory_space<vmem>>, vector<1x512xf32>
    %cst = arith.constant 0.797884583 : f32
    %1 = vector.broadcast %cst : f32 to vector<1x512xf32>
    %2 = arith.mulf %1, %0 : vector<1x512xf32>
    %cst_1 = arith.constant 4.471500e-02 : f32
    %3 = vector.broadcast %cst_1 : f32 to vector<1x512xf32>
    %4 = arith.mulf %3, %0 : vector<1x512xf32>
    %5 = arith.mulf %4, %0 : vector<1x512xf32>
    %cst_2 = arith.constant 1.000000e+00 : f32
    %6 = vector.broadcast %cst_2 : f32 to vector<1x512xf32>
    %7 = arith.addf %6, %5 : vector<1x512xf32>
    %8 = arith.mulf %2, %7 : vector<1x512xf32>
    %cst_3 = arith.constant 5.000000e-01 : f32
    %9 = vector.broadcast %cst_3 : f32 to vector<1x512xf32>
    %10 = arith.mulf %9, %0 : vector<1x512xf32>
    %11 = math.tanh %8 : vector<1x512xf32>
    %cst_4 = arith.constant 1.000000e+00 : f32
    %12 = vector.broadcast %cst_4 : f32 to vector<1x512xf32>
    %13 = arith.addf %12, %11 : vector<1x512xf32>
    %14 = arith.mulf %10, %13 : vector<1x512xf32>
    %c0_5 = arith.constant 0 : index
    %c0_6 = arith.constant 0 : index
    %15 = vector.load %arg2[%c0_5, %c0_6] : memref<1x512xf32, #tpu.memory_space<vmem>>, vector<1x512xf32>
    tpu.vector_store %arg2[%c0_5, %c0_6], %14 {strides = array<i32>} : memref<1x512xf32, #tpu.memory_space<vmem>>, vector<1x512xf32>,
    return
  }
  func.func @transform_0(%arg0: i32) -> (i32, i32) {
    %c0_i32 = arith.constant 0 : i32
    %c0_i32_0 = arith.constant 0 : i32
    return %arg0, %c0_i32 : i32, i32
  }
  func.func @transform_1(%arg0: i32) -> (i32, i32) {
    %c0_i32 = arith.constant 0 : i32
    %c0_i32_0 = arith.constant 0 : i32
    return %arg0, %c0_i32 : i32, i32
  }
}

</mosaic_0001>

<bundles_post_ra>
// kernel: tpu_custom_call.1
= control target key start
LH: loop header
LB: loop body
LE: loop exit
PB: predicated region body
PF: predicated region fallthrough
CT: control target
= control target key end

     0   :  { %6 = vsyncpa [#allocation3], 0  ;;  %s139_s0 = inlined_call_operand.hbm [shape: f32[1,512], index: 0, kind: input, shape index: {}]   ;;  %s140_s1 = inlined_call_operand.hbm [shape: f32[1,512], index: 1, kind: output, shape index: {}]  }
   0x1   :  { %7 = vsyncpa [#allocation4], 0  ;;  %s103_s6 = smov [#allocation2]   ;;  %s55_s10 = scalar_lea.hbm %s139_s0, 64 }
   0x2   :  { %s14_s7 = sshll.u32 %s103_s6, 4  ;;  %p56_p0 = scmp.ne.s32.totalorder %s139_s0, %s55_s10  ;;  %s15_s7 = int_to_ptr.vmem [resolvable:$true] %s14_s7 }
   0x3   :  { %p59_p1 = scmp.lt.u32.totalorder %s55_s10, %s139_s0 }
   0x5   :  { %p61_p2 = pnand %p59_p1, %p56_p0 }
   0x7   :  { %64 = shalt.err (!%p61_p2)
}
   0x8   :  { %s65_s15 = scalar_lea.vmem %s15_s7, 64  ;;  %p70_p4 = scmp.lt.s32.totalorder %s15_s7, %s15_s7 }
   0x9   :  { %p66_p3 = scmp.ne.s32.totalorder %s15_s7, %s65_s15  ;;  %p71_p5 = scmp.lt.s32.totalorder %s65_s15, %s65_s15 }
   0xb   :  { %p72_p6 = por %p71_p5, %p70_p4 }
   0xd   :  { %p73_p7 = pnand %p72_p6, %p66_p3 }
   0xf   :  { %76 = shalt.err (!%p73_p7)
}
  0x10   :  { %17 = dma.hbm_to_vmem [thread:$0]  %s139_s0, 64, %s15_s7, [#allocation3]  }
  0x11   :  { %99 = dma.done.wait [#allocation3], 64  }
  0x12   :  { %100 = vsyncadd [#allocation3], 4294967232  ;;  %v21_v0 = vld [vmem:[#allocation2] sm:$0xf]  ;;  %v31_v6 = vlaneseq  ;;  %s104_s18 = smov [#allocation5]  }
  0x13   :  { %v23_v1 = vmul.f32 0.044715, %v21_v0  ;;  %v22_v2 = vmul.f32 0.7978846, %v21_v0  ;;  %v27_v7 = vmul.f32 0.5, %v21_v0  ;;  %s42_s19 = sshll.u32 %s104_s18, 4  ;;  %s43_s19 = int_to_ptr.vmem [resolvable:$true] %s42_s19 }
  0x14   :  { %vm33_vm0 = vcmp.lt.s32.totalorder %v31_v6, 512  ;;  %s77_s0 = scalar_lea.vmem %s43_s19, 64  ;;  %p82_p9 = scmp.lt.s32.totalorder %s43_s19, %s43_s19 }
  0x15   :  { %v24_v3 = vmul.f32 %v23_v1, %v21_v0  ;;  %p78_p8 = scmp.ne.s32.totalorder %s43_s19, %s77_s0  ;;  %p83_p10 = scmp.lt.s32.totalorder %s77_s0, %s77_s0 }
  0x17   :  { %v25_v4 = vadd.f32 1.0, %v24_v3  ;;  %p84_p11 = por %p83_p10, %p82_p9 }
  0x19   :  { %v26_v5 = vmul.f32 %v25_v4, %v22_v2  ;;  %p85_p12 = pnand %p84_p11, %p78_p8 }
  0x1b   :  { %53 = vtanh.f32 %v26_v5 }
  0x25   :  { %v54_v8 = vpop.eup %53 }
  0x26   :  { %v29_v9 = vadd.f32 1.0, %v54_v8 }
  0x28   :  { %v30_v10 = vmul.f32 %v29_v9, %v27_v7 }
  0x2a   :  { %35 = vst.msk [vmem:[#allocation5] sm:$0xf] %vm33_vm0, %v30_v10 }
  0x2b   :  { %88 = shalt.err (!%p85_p12)
}
  0x2c   :  { %s89_s22 = scalar_lea.hbm %s140_s1, 64 }
  0x2d   :  { %p90_p13 = scmp.ne.s32.totalorder %s140_s1, %s89_s22  ;;  %p93_p0 = scmp.lt.u32.totalorder %s89_s22, %s140_s1 }
  0x2f   :  { %p95_p1 = pnand %p93_p0, %p90_p13 }
  0x31   :  { %98 = shalt.err (!%p95_p1)
}
  0x32   :  { %45 = dma.vmem_to_hbm [thread:$0]  %s43_s19, 64, %s140_s1, [#allocation4]  }
  0x33   :  { %101 = dma.done.wait [#allocation4], 64  }
  0x34   :  { %102 = vsyncadd [#allocation4], 4294967232 }
  0x35   :  { %49 = vsyncpa [#allocation3], 1 }
  0x36   :  { %50 = vsyncpa [#allocation4], 1 }

</bundles_post_ra>
